<compile_context>
chip_gen: v7x
topology: tpu7x:2x2x1
jax: 0.10.0
libtpu: 0.0.40
codegen_flags: <defaults>
</compile_context>

<pallas_src>
import math

import jax
import jax.numpy as jnp
from jax.experimental import pallas as pl
from jax.experimental.pallas import tpu as pltpu


# ----------------------------- kernels ---------------------------------------

def _ffn_kernel_resident(x_ref, w1_ref, b1_ref, w2_ref, b2_ref, o_ref):
    """Whole W1/W2/biases resident in VMEM: single fused pass, no accumulator scratch."""
    h = jnp.dot(x_ref[...], w1_ref[...], preferred_element_type=jnp.float32)
    h = jnp.maximum(h + b1_ref[...].astype(jnp.float32), 0.0)
    # dropout (eval mode) == identity
    out = jnp.dot(h.astype(w2_ref.dtype), w2_ref[...],
                  preferred_element_type=jnp.float32)
    o_ref[...] = (out + b2_ref[...].astype(jnp.float32)).astype(o_ref.dtype)


def _ffn_kernel_stream(x_ref, w1_ref, b1_ref, w2_ref, b2_ref, o_ref, acc_ref):
    """d_ff streamed in chunks (reduction grid axis); f32 VMEM accumulator.

    b1_ref holds ALL d_ff bias chunks, shape (n_k, tk); it is resident (constant index
    map -> fetched once) and row k is the chunk for grid step k.
    """
    k = pl.program_id(1)

    @pl.when(k == 0)
    def _init():
        acc_ref[...] = jnp.zeros_like(acc_ref)

    b1_chunk = b1_ref[pl.ds(k, 1), :]                      # (1, tk)

    # linear 1 (+ bias) + relu for this d_ff chunk (native-dtype MXU feed, f32 accum).
    h = jnp.dot(x_ref[...], w1_ref[...], preferred_element_type=jnp.float32)
    h = jnp.maximum(h + b1_chunk.astype(jnp.float32), 0.0)

    # dropout (eval mode) == identity

    # linear 2: partial product of this d_ff chunk, accumulated in f32 scratch.
    acc_ref[...] += jnp.dot(h.astype(w2_ref.dtype), w2_ref[...],
                            preferred_element_type=jnp.float32)

    @pl.when(k == pl.num_programs(1) - 1)
    def _finalize():
        o_ref[...] = (acc_ref[...] + b2_ref[...].astype(jnp.float32)).astype(o_ref.dtype)


# ----------------------------- wrapper ---------------------------------------

def _round_up(x, m):
    return (x + m - 1) // m * m


def _vmem_budget():
    """(per-TC VMEM capacity, usable budget with ~20% headroom)."""
    try:
        cap = int(pltpu.get_tpu_info().vmem_capacity_bytes)
    except Exception:
        cap = 64 << 20          # conservative fallback: v7x per-TensorCore VMEM
    return cap, int(cap * 0.8)


def positionwise_feed_forward(x, w1, b1, w2, b2, *, tile_rows=None, tile_ff=None,
                              vmem_limit_bytes=None, mode="auto"):
    """x: (..., d_model).  W1: (d_model, d_ff), W2: (d_ff, d_model) (transposed vs torch).

    mode: "auto" (prefer weight-resident when it fits VMEM), "resident", or "stream".
    Returns the same shape/dtype as x.
    """
    assert mode in ("auto", "resident", "stream")
    d_model = x.shape[-1]
    d_ff = w1.shape[-1]
    orig_shape = x.shape
    x2d = x.reshape(-1, d_model)
    n_rows = x2d.shape[0]

    a_item = x.dtype.itemsize
    w_item = w1.dtype.itemsize
    b_item = b1.dtype.itemsize

    b1_2d = jnp.reshape(b1, (1, d_ff))
    b2_2d = jnp.reshape(b2, (1, d_model))

    sub = 8 if a_item >= 4 else 16                       # sublane multiple for row tiles
    vmem_cap, budget = _vmem_budget()
    tm_cap = max(tile_rows if tile_rows is not None else 1024, sub)

    def clamp_tm(t):
        if t >= n_rows:
            return n_rows                                # full-extent block is always legal
        return max(sub, (t // sub) * sub)

    flops = 4 * n_rows * d_model * d_ff                  # two matmuls, 2 flops/MAC

    # -------------------------------------------------------------------------
    # Path A: weights fully VMEM-resident.  Constant index maps => each weight is
    # DMA'd once per pallas_call (per TensorCore on megacore), and the accumulator
    # scratch round trip is skipped.  VMEM check counts 2x weights because Pallas
    # double-buffers every input block.
    # -------------------------------------------------------------------------
    w_res_bytes = (w1.size + w2.size) * w_item + (d_ff + d_model) * b_item
    per_row_res = (4 * d_model * a_item                  # x + out tiles, double-buffered
                   + d_ff * (4 + w_item)                 # h intermediate (f32 + cast copy)
                   + 4 * d_model)                        # f32 output intermediate
    if mode != "stream" and 2 * w_res_bytes < budget:
        tm_budget = (budget - 2 * w_res_bytes) // per_row_res
        if tm_budget >= min(n_rows, sub):
            tm = clamp_tm(min(tm_budget, tm_cap))
            n_i = pl.cdiv(n_rows, tm)

            in_specs = [
                pl.BlockSpec((tm, d_model), lambda i: (i, 0)),     # x row tile
                pl.BlockSpec((d_model, d_ff), lambda i: (0, 0)),   # W1 (resident)
                pl.BlockSpec((1, d_ff), lambda i: (0, 0)),         # b1 (resident)
                pl.BlockSpec((d_ff, d_model), lambda i: (0, 0)),   # W2 (resident)
                pl.BlockSpec((1, d_model), lambda i: (0, 0)),      # b2 (resident)
            ]
            out_specs = pl.BlockSpec((tm, d_model), lambda i: (i, 0))

            vmem_est = 2 * w_res_bytes + tm * per_row_res
            vlim = vmem_limit_bytes or min(vmem_cap, max(32 << 20, int(1.2 * vmem_est)))
            cost = pl.CostEstimate(
                flops=flops, transcendentals=0,
                bytes_accessed=int(2 * n_rows * d_model * a_item + w_res_bytes))

            out2d = pl.pallas_call(
                _ffn_kernel_resident,
                out_shape=jax.ShapeDtypeStruct((n_rows, d_model), x.dtype),
                grid_spec=pltpu.PrefetchScalarGridSpec(
                    num_scalar_prefetch=0, grid=(n_i,),
                    in_specs=in_specs, out_specs=out_specs),
                compiler_params=pltpu.CompilerParams(
                    dimension_semantics=("parallel",),
                    vmem_limit_bytes=int(vlim)),
                cost_estimate=cost,
            )(x2d, w1, b1_2d, w2, b2_2d)
            return out2d.reshape(orig_shape)

    # -------------------------------------------------------------------------
    # Path B: stream d_ff in lane-aligned chunks.  W1/W2 are re-fetched once per
    # row tile, so TM is sized as large as the VMEM budget allows (default cap
    # 1024) to push arithmetic intensity past the HBM machine balance.  Biases
    # are resident (fetched once).
    # -------------------------------------------------------------------------
    tk_target = tile_ff if tile_ff is not None else 1024
    tk_target = max(128, min((tk_target // 128) * 128, _round_up(d_ff, 128)))
    tk = None
    t = tk_target
    while t >= 128:                                      # prefer a divisor (no padding)
        if d_ff % t == 0:
            tk = t
            break
        t -= 128
    if tk is None:                                       # awkward d_ff: zero-pad chunks
        tk = tk_target
    d_ff_pad = _round_up(d_ff, tk)
    n_k = d_ff_pad // tk

    while True:
        fixed = (4 * d_model * tk * w_item               # W1+W2 chunks, double-buffered
                 + 2 * (d_ff_pad + d_model) * b_item)    # resident biases (2 bufs each)
        per_row = (4 * d_model * a_item                  # x + out tiles, double-buffered
                   + 4 * d_model                         # f32 accumulator scratch
                   + tk * (4 + w_item))                  # h chunk (f32 + cast copy)
        avail = budget - fixed
        tm_budget = avail // per_row if avail > 0 else 0
        if tm_budget >= min(n_rows, sub) or tk <= 128:
            break
        tk = max(128, (tk // 2) // 128 * 128)            # shrink chunk and retry
        d_ff_pad = _round_up(d_ff, tk)
        n_k = d_ff_pad // tk

    tm = clamp_tm(min(max(tm_budget, sub), tm_cap))
    n_i = pl.cdiv(n_rows, tm)

    if d_ff_pad != d_ff:
        # Zero-padding d_ff is exact: relu(x@0 + 0) == 0 and the padded W2 rows are 0.
        pad = d_ff_pad - d_ff
        w1p = jnp.pad(w1, ((0, 0), (0, pad)))
        b1p = jnp.pad(b1_2d, ((0, 0), (0, pad)))
        w2p = jnp.pad(w2, ((0, pad), (0, 0)))
    else:
        w1p, b1p, w2p = w1, b1_2d, w2
    b1_chunks = b1p.reshape(n_k, tk)                     # row k == bias chunk k

    in_specs = [
        pl.BlockSpec((tm, d_model), lambda i, k: (i, 0)),   # x row tile
        pl.BlockSpec((d_model, tk), lambda i, k: (0, k)),   # W1 chunk
        pl.BlockSpec((n_k, tk),     lambda i, k: (0, 0)),   # all b1 chunks (resident)
        pl.BlockSpec((tk, d_model), lambda i, k: (k, 0)),   # W2 chunk
        pl.BlockSpec((1, d_model),  lambda i, k: (0, 0)),   # b2 (resident)
    ]
    out_specs = pl.BlockSpec((tm, d_model), lambda i, k: (i, 0))

    vmem_est = fixed + tm * per_row
    vlim = vmem_limit_bytes or min(vmem_cap, max(32 << 20, int(1.2 * vmem_est)))
    w_stream_bytes = (w1p.size + w2p.size) * w_item
    cost = pl.CostEstimate(
        flops=flops, transcendentals=0,
        bytes_accessed=int(2 * n_rows * d_model * a_item
                           + n_i * w_stream_bytes        # weights re-streamed per row tile
                           + (d_ff_pad + d_model) * b_item))

    out2d = pl.pallas_call(
        _ffn_kernel_stream,
        out_shape=jax.ShapeDtypeStruct((n_rows, d_model), x.dtype),
        grid_spec=pltpu.PrefetchScalarGridSpec(
            num_scalar_prefetch=0,
            grid=(n_i, n_k),                 # rows (parallel) outer, d_ff reduction inner
            in_specs=in_specs, out_specs=out_specs,
            scratch_shapes=[pltpu.VMEM((tm, d_model), jnp.float32)]),
        compiler_params=pltpu.CompilerParams(
            dimension_semantics=("parallel", "arbitrary"),
            vmem_limit_bytes=int(vlim)),
        cost_estimate=cost,
    )(x2d, w1p, b1_chunks, w2p, b2_2d)
    return out2d.reshape(orig_shape)


def init_params(key, d_model, d_ff, dtype=jnp.float32):
    """Deterministic init matching nn.Linear's U(-1/sqrt(fan_in), 1/sqrt(fan_in))."""
    k1, k2, k3, k4 = jax.random.split(key, 4)
    bound1 = 1.0 / math.sqrt(d_model)
    bound2 = 1.0 / math.sqrt(d_ff)
    # stored transposed relative to torch: (in, out)
    w1 = jax.random.uniform(k1, (d_model, d_ff), jnp.float32, -bound1, bound1).astype(dtype)
    b1 = jax.random.uniform(k2, (d_ff,), jnp.float32, -bound1, bound1).astype(dtype)
    w2 = jax.random.uniform(k3, (d_ff, d_model), jnp.float32, -bound2, bound2).astype(dtype)
    b2 = jax.random.uniform(k4, (d_model,), jnp.float32, -bound2, bound2).astype(dtype)
    return w1, b1, w2, b2


if __name__ == "__main__":
    def reference(x, w1, b1, w2, b2):
        xf = x.astype(jnp.float32)
        h = jnp.maximum(xf @ w1.astype(jnp.float32) + b1.astype(jnp.float32), 0.0)
        out = h @ w2.astype(jnp.float32) + b2.astype(jnp.float32)
        return out.astype(x.dtype)

    keys = jax.random.split(jax.random.PRNGKey(0), 8)

    # --- test 1: module demo shape (auto -> weight-resident path) --------------------
    batch, seq, d_model, d_ff = 2, 8, 32, 64
    x = jax.random.normal(keys[0], (batch, seq, d_model), dtype=jnp.float32)
    w1, b1, w2, b2 = init_params(keys[1], d_model, d_ff, jnp.float32)
    out = jax.block_until_ready(positionwise_feed_forward(x, w1, b1, w2, b2))
    ref = reference(x, w1, b1, w2, b2)
    assert out.shape == x.shape and out.dtype == x.dtype
    assert jnp.allclose(out, ref, atol=1e-5, rtol=1e-5), "test1 mismatch"

    # --- test 2: forced streaming, non-128-divisible d_ff (zero-padded chunks),
    #             multiple row tiles with a partial last tile -------------------------
    batch, seq, d_model, d_ff = 2, 100, 128, 320
    x = jax.random.normal(keys[2], (batch, seq, d_model), dtype=jnp.float32)
    w1, b1, w2, b2 = init_params(keys[3], d_model, d_ff, jnp.float32)
    out = jax.block_until_ready(
        positionwise_feed_forward(x, w1, b1, w2, b2, tile_rows=64, tile_ff=256,
                                  mode="stream"))
    ref = reference(x, w1, b1, w2, b2)
    assert out.shape == x.shape and out.dtype == x.dtype
    assert jnp.allclose(out, ref, atol=5e-4, rtol=5e-4), "test2 mismatch"

    # --- test 3: native bf16 operands, auto -> weight-resident, lane-dense d_model ---
    batch, seq, d_model, d_ff = 2, 24, 128, 512
    x = jax.random.normal(keys[4], (batch, seq, d_model), dtype=jnp.float32).astype(jnp.bfloat16)
    w1, b1, w2, b2 = init_params(keys[5], d_model, d_ff, jnp.bfloat16)
    out = jax.block_until_ready(positionwise_feed_forward(x, w1, b1, w2, b2))
    ref = reference(x, w1, b1, w2, b2)
    assert out.shape == x.shape and out.dtype == jnp.bfloat16
    assert jnp.allclose(out.astype(jnp.float32), ref.astype(jnp.float32),
                        atol=5e-2, rtol=5e-2), "test3 mismatch"

    # --- test 4: forced streaming, bf16, d_ff divisible by the chunk (no padding) ----
    batch, seq, d_model, d_ff = 2, 64, 128, 1024
    x = jax.random.normal(keys[6], (batch, seq, d_model), dtype=jnp.float32).astype(jnp.bfloat16)
    w1, b1, w2, b2 = init_params(keys[7], d_model, d_ff, jnp.bfloat16)
    out = jax.block_until_ready(
        positionwise_feed_forward(x, w1, b1, w2, b2, tile_ff=512, mode="stream"))
    ref = reference(x, w1, b1, w2, b2)
    assert out.shape == x.shape and out.dtype == jnp.bfloat16
    assert jnp.allclose(out.astype(jnp.float32), ref.astype(jnp.float32),
                        atol=5e-2, rtol=5e-2), "test4 mismatch"

    print("KERNEL_OK")
</pallas_src>

<mosaic_0001>
module attributes {stable_mosaic.version = 11 : i64} {
  func.func @_ffn_kernel_resident(%arg0: i32, %arg1: memref<16x32xf32, #tpu.memory_space<vmem>>, %arg2: memref<32x64xf32, #tpu.memory_space<vmem>>, %arg3: memref<1x64xf32, #tpu.memory_space<vmem>>, %arg4: memref<64x32xf32, #tpu.memory_space<vmem>>, %arg5: memref<1x32xf32, #tpu.memory_space<vmem>>, %arg6: memref<16x32xf32, #tpu.memory_space<vmem>>) attributes {dimension_semantics = [#tpu.dimension_semantics<parallel>], iteration_bounds = array<i64: 1>, scalar_prefetch = 0 : i64, scratch_operands = 0 : i64, tpu.core_type = #tpu.core_type<tc>, window_params = [{transform_indices = @transform_0, window_bounds = array<i64: 16, 32>}, {pipeline_mode = #tpu.pipeline_mode<synchronous>, transform_indices = @transform_1, window_bounds = array<i64: 32, 64>}, {pipeline_mode = #tpu.pipeline_mode<synchronous>, transform_indices = @transform_2, window_bounds = array<i64: 1, 64>}, {pipeline_mode = #tpu.pipeline_mode<synchronous>, transform_indices = @transform_3, window_bounds = array<i64: 64, 32>}, {pipeline_mode = #tpu.pipeline_mode<synchronous>, transform_indices = @transform_4, window_bounds = array<i64: 1, 32>}, {transform_indices = @transform_5, window_bounds = array<i64: 16, 32>}]} {
    %c0 = arith.constant 0 : index
    %c0_0 = arith.constant 0 : index
    %0 = vector.load %arg1[%c0, %c0_0] : memref<16x32xf32, #tpu.memory_space<vmem>>, vector<16x32xf32>
    %c0_1 = arith.constant 0 : index
    %c0_2 = arith.constant 0 : index
    %1 = vector.load %arg2[%c0_1, %c0_2] : memref<32x64xf32, #tpu.memory_space<vmem>>, vector<32x64xf32>
    %cst = arith.constant dense<0.000000e+00> : vector<16x64xf32>
    %2 = tpu.matmul %0, %1, %cst {dimension_numbers = #tpu.dot_dimension_numbers<[1], [0], [0], [1], [0, 0, 1, 1], [], []>} : vector<16x32xf32>, vector<32x64xf32>, vector<16x64xf32> -> vector<16x64xf32>
    %c0_3 = arith.constant 0 : index
    %c0_4 = arith.constant 0 : index
    %3 = vector.load %arg3[%c0_3, %c0_4] : memref<1x64xf32, #tpu.memory_space<vmem>>, vector<1x64xf32>
    %4 = vector.broadcast %3 : vector<1x64xf32> to vector<16x64xf32>
    %5 = arith.addf %2, %4 : vector<16x64xf32>
    %cst_5 = arith.constant 0.000000e+00 : f32
    %6 = vector.broadcast %cst_5 : f32 to vector<16x64xf32>
    %7 = arith.maximumf %5, %6 : vector<16x64xf32>
    %c0_6 = arith.constant 0 : index
    %c0_7 = arith.constant 0 : index
    %8 = vector.load %arg4[%c0_6, %c0_7] : memref<64x32xf32, #tpu.memory_space<vmem>>, vector<64x32xf32>
    %cst_8 = arith.constant dense<0.000000e+00> : vector<16x32xf32>
    %9 = tpu.matmul %7, %8, %cst_8 {dimension_numbers = #tpu.dot_dimension_numbers<[1], [0], [0], [1], [0, 0, 1, 1], [], []>} : vector<16x64xf32>, vector<64x32xf32>, vector<16x32xf32> -> vector<16x32xf32>
    %c0_9 = arith.constant 0 : index
    %c0_10 = arith.constant 0 : index
    %10 = vector.load %arg5[%c0_9, %c0_10] : memref<1x32xf32, #tpu.memory_space<vmem>>, vector<1x32xf32>
    %11 = vector.broadcast %10 : vector<1x32xf32> to vector<16x32xf32>
    %12 = arith.addf %9, %11 : vector<16x32xf32>
    %c0_11 = arith.constant 0 : index
    %c0_12 = arith.constant 0 : index
    %13 = vector.load %arg6[%c0_11, %c0_12] : memref<16x32xf32, #tpu.memory_space<vmem>>, vector<16x32xf32>
    tpu.vector_store %arg6[%c0_11, %c0_12], %12 {strides = array<i32>} : memref<16x32xf32, #tpu.memory_space<vmem>>, vector<16x32xf32>,
    return
  }
  func.func @transform_0(%arg0: i32) -> (i32, i32) {
    %c0_i32 = arith.constant 0 : i32
    %c0_i32_0 = arith.constant 0 : i32
    return %arg0, %c0_i32 : i32, i32
  }
  func.func @transform_1(%arg0: i32) -> (i32, i32) {
    %c0_i32 = arith.constant 0 : i32
    %c0_i32_0 = arith.constant 0 : i32
    %c0_i32_1 = arith.constant 0 : i32
    return %c0_i32, %c0_i32_0 : i32, i32
  }
  func.func @transform_2(%arg0: i32) -> (i32, i32) {
    %c0_i32 = arith.constant 0 : i32
    %c0_i32_0 = arith.constant 0 : i32
    %c0_i32_1 = arith.constant 0 : i32
    return %c0_i32, %c0_i32_0 : i32, i32
  }
  func.func @transform_3(%arg0: i32) -> (i32, i32) {
    %c0_i32 = arith.constant 0 : i32
    %c0_i32_0 = arith.constant 0 : i32
    %c0_i32_1 = arith.constant 0 : i32
    return %c0_i32, %c0_i32_0 : i32, i32
  }
  func.func @transform_4(%arg0: i32) -> (i32, i32) {
    %c0_i32 = arith.constant 0 : i32
    %c0_i32_0 = arith.constant 0 : i32
    %c0_i32_1 = arith.constant 0 : i32
    return %c0_i32, %c0_i32_0 : i32, i32
  }
  func.func @transform_5(%arg0: i32) -> (i32, i32) {
    %c0_i32 = arith.constant 0 : i32
    %c0_i32_0 = arith.constant 0 : i32
    return %arg0, %c0_i32 : i32, i32
  }
}

</mosaic_0001>

<bundles_post_ra>
// kernel: tpu_custom_call.1
= control target key start
LH: loop header
LB: loop body
LE: loop exit
PB: predicated region body
PF: predicated region fallthrough
CT: control target
= control target key end

     0   :  { %vm34_vm0 = vcmask 261120   ;;  %s433_s0 = inlined_call_operand.vmem [shape: f32[16,32], index: 0, kind: input, shape index: {}]   ;;  %s434_s1 = inlined_call_operand.vmem [shape: f32[32,64], index: 1, kind: input, shape index: {}]   ;;  %s435_s2 = inlined_call_operand.vmem [shape: f32[1,64], index: 2, kind: input, shape index: {}]   ;;  %s436_s3 = inlined_call_operand.vmem [shape: f32[64,32], index: 3, kind: input, shape index: {}]   ;;  %s437_s4 = inlined_call_operand.vmem [shape: f32[1,32], index: 4, kind: input, shape index: {}]   ;;  %s438_s5 = inlined_call_operand.hbm [shape: f32[16,32], index: 5, kind: output, shape index: {}]  }
   0x1   :  { %v23_v0 = vld [vmem:[%s434_s1] sm:$0xff]  ;;  %v24_v1 = vld [vmem:[%s434_s1 + $0x8] sm:$0xff]  ;;  %v25_v2 = vld [vmem:[%s434_s1 + $0x10] sm:$0xff] }
   0x2   :  { %v285_v3 = vpack.c.bf16 %v24_v1, %v23_v0  ;;  %v26_v4 = vld [vmem:[%s434_s1 + $0x18] sm:$0xff]  ;;  %v21_v5 = vld [vmem:[%s433_s0] sm:$0xff]  ;;  %v119_v8 = vld [vmem:[%s436_s3 + $0x8] sm:$0xff] }
   0x3   :  { %v289_v6 = vpack.c.bf16 %v26_v4, %v25_v2  ;;  %263 = vmatprep.mubr.msk.f32.mxu0 %vm34_vm0, %v21_v5  ;;  %v118_v7 = vld [vmem:[%s436_s3] sm:$0xff]  ;;  %v120_v9 = vld [vmem:[%s436_s3 + $0x10] sm:$0xff]  ;;  %v121_v11 = vld [vmem:[%s436_s3 + $0x18] sm:$0xff] }
   0x4   :  { %286 = vmatprep.subr.bf16.mxu0 %v285_v3  ;;  %v293_v10 = vpack.c.bf16 %v119_v8, %v118_v7  ;;  %v297_v12 = vpack.c.bf16 %v121_v11, %v120_v9  ;;  %v122_v13 = vld [vmem:[%s436_s3 + $0x20] sm:$0xff]  ;;  %v123_v14 = vld [vmem:[%s436_s3 + $0x28] sm:$0xff] }
   0x5   :  { %288 = vmatpush3.bf16.msra.mxu0 %v285_v3 }
   0x6   :  { %10 = vsyncpa [#allocation3], 0  ;;  %290 = vmatprep.subr.bf16.mxu0 %v289_v6  ;;  %294 = vmatprep.subr.bf16.mxu1 %v293_v10  ;;  %v301_v15 = vpack.c.bf16 %v123_v14, %v122_v13  ;;  %v22_v16 = vld [vmem:[%s433_s0 + $0x8] sm:$0xff]  ;;  %v124_v17 = vld [vmem:[%s436_s3 + $0x30] sm:$0xff]  ;;  %vm133_vm1 = vcmask 523264  }
   0x7   :  { %296 = vmatpush3.bf16.msra.mxu1 %v293_v10  ;;  %v125_v18 = vld [vmem:[%s436_s3 + $0x38] sm:$0xff]  ;;  %v233_v20 = vld [vmem:[%s435_s2] ss:$0 sm:$0xff]  ;;  %s336_s3 = smov [#allocation2]  }
   0x8   :  { %298 = vmatprep.subr.bf16.mxu1 %v297_v12  ;;  %v305_v19 = vpack.c.bf16 %v125_v18, %v124_v17  ;;  %v236_v27 = vld [vmem:[%s437_s4] ss:$0 sm:$0xff]  ;;  %s222_s23 = sshll.u32 %s336_s3, 4  ;;  %s223_s23 = int_to_ptr.vmem [resolvable:$true] %s222_s23 }
   0x9   :  { %292 = vmatpush3.bf16.msra.mxu0 %v289_v6  ;;  %s312_s2 = scalar_lea.vmem %s223_s23, 256  ;;  %p317_p1 = scmp.lt.s32.totalorder %s223_s23, %s223_s23 }
   0xa   :  { %p313_p0 = scmp.ne.s32.totalorder %s223_s23, %s312_s2  ;;  %p318_p2 = scmp.lt.s32.totalorder %s312_s2, %s312_s2 }
   0xb   :  { %300 = vmatpush3.bf16.msra.mxu1 %v297_v12 }
   0xc   :  { %264 = vmatmul.mubr.msk.f32.vlgmr.msra.gmra.mrb[0].mxu0 %vm34_vm0, %v22_v16  ;;  %302 = vmatprep.subr.bf16.mxu1 %v301_v15  ;;  %p319_p3 = por %p318_p2, %p317_p1 }
   0xe   :  { %p320_p4 = pnand %p319_p3, %p313_p0 }
   0xf   :  { %304 = vmatpush3.bf16.msra.mxu1 %v301_v15 }
  0x10   :  { %306 = vmatprep.subr.bf16.mxu1 %v305_v19 }
  0x13   :  { %308 = vmatpush3.bf16.msra.mxu1 %v305_v19 }
  0xdf   :  { %v265_v21 = vpop.f32.mrb[0].mxu0 }
  0xe0   :  { %v113_v22 = vadd.f32 %v265_v21, %v233_v20  ;;  %v107_v23 = vpop.f32.mrb[1].mxu0 }
  0xe1   :  { %v108_v24 = vadd.f32 %v233_v20, %v107_v23 }
  0xe2   :  { %v117_v26 = vmax.f32 %v113_v22, 0.0 }
  0xe3   :  { %v116_v25 = vmax.f32 %v108_v24, 0.0 }
  0xe5   :  { %282 = vmatprep.mubr.msk.f32.mxu1 %vm133_vm1, %v116_v25 }
  0xe6   :  { %283 = vmatmul.mubr.msk.f32.vlgmr.msra.gmra.mrb[0].mxu1 %vm133_vm1, %v117_v26 }
 0x1b9   :  { %v284_v28 = vpop.f32.mrb[0].mxu1 }
 0x1ba   :  { %v212_v29 = vadd.f32 %v284_v28, %v236_v27  ;;  %v206_v30 = vpop.f32.mrb[1].mxu1 }
 0x1bb   :  { %v207_v31 = vadd.f32 %v236_v27, %v206_v30 }
 0x1bc   :  { %216 = vst.msk [vmem:[#allocation2 + $0x8] sm:$0xff] %vm34_vm0, %v212_v29 }
 0x1bd   :  { %215 = vst.msk [vmem:[#allocation2] sm:$0xff] %vm34_vm0, %v207_v31 }
 0x1be   :  { %323 = shalt.err (!%p320_p4)
}
 0x1bf   :  { %s324_s25 = scalar_lea.hbm %s438_s5, 256 }
 0x1c0   :  { %p325_p5 = scmp.ne.s32.totalorder %s438_s5, %s324_s25  ;;  %p328_p6 = scmp.lt.u32.totalorder %s324_s25, %s438_s5 }
 0x1c2   :  { %p330_p7 = pnand %p328_p6, %p325_p5 }
 0x1c4   :  { %333 = shalt.err (!%p330_p7)
}
 0x1c5   :  { %s337_s30 = smov 128   ;;  %s338_s6 = smov 8  }
 0x1c6   :  { %228 = dma.vmem_to_hbm [thread:$0]  %s223_s23, 256, %s438_s5, [#allocation3], %s337_s30, %s337_s30, %s338_s6  }
 0x1c7   :  { %334 = dma.done.wait [#allocation3], 256  }
 0x1c8   :  { %335 = vsyncadd [#allocation3], 4294967040 }
 0x1c9   :  { %232 = vsyncpa [#allocation3], 1 }

</bundles_post_ra>
